<compile_context>
chip_gen: v7x
topology: tpu7x:2x2x1
jax: 0.10.0
libtpu: 0.0.40
codegen_flags: <defaults>
</compile_context>

<pallas_src>
import jax
import jax.numpy as jnp
from jax.experimental import pallas as pl
from jax.experimental.pallas import tpu as pltpu

K_IN = 28 * 28     # 784  (full-extent lane dim for x / w1 rows)
H1 = 128           # fc1 out (already lane-aligned)
H2 = 64            # fc2 out (lane-padded to N_PAD with zero columns)
N_OUT = 10         # fc3 out (lane-padded to N_PAD with zero columns)
N_PAD = 128        # lane-dense width for fc2/fc3/output


def _round_up(x, m):
    return ((x + m - 1) // m) * m


def _cdiv(a, b):
    return -(-a // b)


def mlp_kernel(x_ref, w1_ref, b1_ref, w2_ref, b2_ref, w3_ref, b3_ref, o_ref):
    # x arrives as f32 straight from HBM; cast to bf16 in VMEM (no HBM cost).
    x = x_ref[...].astype(jnp.bfloat16)
    # fc1 + relu   (bf16 x bf16 -> f32 accumulate on the MXU)
    h1 = jnp.dot(x, w1_ref[...], preferred_element_type=jnp.float32)
    h1 = jnp.maximum(h1 + b1_ref[...], 0.0)
    # fc2 + relu   (lane-padded to 128; pad columns are exactly zero)
    h2 = jnp.dot(h1.astype(jnp.bfloat16), w2_ref[...],
                 preferred_element_type=jnp.float32)
    h2 = jnp.maximum(h2 + b2_ref[...], 0.0)
    # fc3 (no activation) — lane-dense (TB, 128) unmasked store.
    o_ref[...] = jnp.dot(h2.astype(jnp.bfloat16), w3_ref[...],
                         preferred_element_type=jnp.float32) + b3_ref[...]


def _choose_tile(B, tb_max):
    """Waste-balanced batch tile: multiple of 16, >=2 grid steps for large B."""
    if B <= 16:
        return B                            # single block; block dim == array dim is legal
    n_tiles = max(2, _cdiv(B, tb_max))      # >=2 steps so v7x megacore shards the batch
    tb = _round_up(_cdiv(B, n_tiles), 16)   # last tile nearly full
    return min(tb, tb_max)


def simple_nn_forward(x_nchw, params, *, tb=1024, slice_output=True):
    """x_nchw: (B, 1, 28, 28) float32.

    Returns (B, 10) f32 logits; with slice_output=False returns the lane-dense
    (B, 128) slab so a downstream consumer can fuse the slice / argmax / loss.
    """
    w1, b1, w2, b2, w3, b3 = params
    B = x_nchw.shape[0]
    x = x_nchw.reshape(B, K_IN)             # torch.flatten(x, 1) — layout-only

    TB = _choose_tile(B, tb)
    grid = (_cdiv(B, TB),)                  # ragged final tile is masked by Pallas

    # Resident weights: (in, out) layout, zero-padded to lane-dense shapes, bf16 (~300 KiB).
    w1_b = w1.astype(jnp.bfloat16)                                               # (784, 128)
    b1_b = b1.reshape(1, H1).astype(jnp.float32)                                 # (1, 128)
    w2_b = jnp.pad(w2, ((0, 0), (0, N_PAD - H2))).astype(jnp.bfloat16)           # (128, 128)
    b2_b = jnp.pad(b2.reshape(1, H2), ((0, 0), (0, N_PAD - H2))).astype(jnp.float32)
    w3_b = jnp.pad(w3, ((0, N_PAD - H2), (0, N_PAD - N_OUT))).astype(jnp.bfloat16)  # (128, 128)
    b3_b = jnp.pad(b3.reshape(1, N_OUT), ((0, 0), (0, N_PAD - N_OUT))).astype(jnp.float32)

    flops = 2 * B * (K_IN * H1 + H1 * N_PAD + N_PAD * N_PAD)
    bytes_accessed = (
        x.size * x.dtype.itemsize                              # x read once, f32
        + (w1_b.size + w2_b.size + w3_b.size) * 2              # bf16 weights
        + (b1_b.size + b2_b.size + b3_b.size) * 4              # f32 biases
        + B * N_PAD * 4                                        # f32 output
    )

    out = pl.pallas_call(
        mlp_kernel,
        out_shape=jax.ShapeDtypeStruct((B, N_PAD), jnp.float32),
        grid=grid,
        in_specs=[
            pl.BlockSpec((TB, K_IN), lambda i: (i, 0)),      # x tile (double-buffered)
            pl.BlockSpec((K_IN, H1), lambda i: (0, 0)),      # w1 (resident)
            pl.BlockSpec((1, H1), lambda i: (0, 0)),         # b1
            pl.BlockSpec((H1, N_PAD), lambda i: (0, 0)),     # w2
            pl.BlockSpec((1, N_PAD), lambda i: (0, 0)),      # b2
            pl.BlockSpec((N_PAD, N_PAD), lambda i: (0, 0)),  # w3
            pl.BlockSpec((1, N_PAD), lambda i: (0, 0)),      # b3
        ],
        out_specs=pl.BlockSpec((TB, N_PAD), lambda i: (i, 0)),
        compiler_params=pltpu.CompilerParams(
            dimension_semantics=("parallel",),
        ),
        cost_estimate=pl.CostEstimate(
            flops=flops, transcendentals=0, bytes_accessed=bytes_accessed),
    )(x, w1_b, b1_b, w2_b, b2_b, w3_b, b3_b)

    return out[:, :N_OUT] if slice_output else out


def init_params(key):
    """Deterministic init matching nn.Linear (uniform +-1/sqrt(fan_in)).

    torch stores fc.weight as (out, in); we keep the transposed (in, out)
    layout so the kernel computes y = x @ W + b directly.
    """
    k1, k2, k3, k4, k5, k6 = jax.random.split(key, 6)

    def lin(kw, kb, fan_in, fan_out):
        bound = 1.0 / jnp.sqrt(fan_in)
        w = jax.random.uniform(kw, (fan_in, fan_out), jnp.float32, -bound, bound)
        b = jax.random.uniform(kb, (1, fan_out), jnp.float32, -bound, bound)
        return w, b

    w1, b1 = lin(k1, k2, K_IN, H1)
    w2, b2 = lin(k3, k4, H1, H2)
    w3, b3 = lin(k5, k6, H2, N_OUT)
    return (w1, b1, w2, b2, w3, b3)


def reference_forward_f32(x_nchw, params):
    """Full-precision reference (matches torch semantics)."""
    w1, b1, w2, b2, w3, b3 = params
    x = x_nchw.reshape(x_nchw.shape[0], -1)
    h1 = jnp.maximum(x @ w1 + b1, 0.0)
    h2 = jnp.maximum(h1 @ w2 + b2, 0.0)
    return h2 @ w3 + b3


def reference_forward_bf16(x_nchw, params):
    """Reference with the same bf16-input / f32-accumulate recipe as the kernel."""
    w1, b1, w2, b2, w3, b3 = params
    x = x_nchw.reshape(x_nchw.shape[0], -1).astype(jnp.bfloat16)
    h1 = jnp.dot(x, w1.astype(jnp.bfloat16), preferred_element_type=jnp.float32) + b1
    h1 = jnp.maximum(h1, 0.0)
    h2 = jnp.dot(h1.astype(jnp.bfloat16), w2.astype(jnp.bfloat16),
                 preferred_element_type=jnp.float32) + b2
    h2 = jnp.maximum(h2, 0.0)
    return jnp.dot(h2.astype(jnp.bfloat16), w3.astype(jnp.bfloat16),
                   preferred_element_type=jnp.float32) + b3


if __name__ == "__main__":
    key = jax.random.PRNGKey(0)
    kx, kp, kx2 = jax.random.split(key, 3)

    params = init_params(kp)

    # MNIST-like input: batch=2, NCHW (2, 1, 28, 28) -> single full-extent tile.
    x = jax.random.normal(kx, (2, 1, 28, 28), dtype=jnp.float32)
    out = jax.block_until_ready(simple_nn_forward(x, params))
    assert out.shape == (2, N_OUT)

    # Exactness vs a reference using the same bf16/f32-accum recipe.
    ref_bf16 = reference_forward_bf16(x, params)
    assert jnp.allclose(out, ref_bf16, atol=1e-3, rtol=1e-3), \
        "mismatch vs bf16-emulating reference"

    # Sanity vs full-precision reference (bf16 rounding tolerance).
    # NOTE: inputs/weights are deliberately computed in bf16 (f32 accumulate);
    # this is a precision drop vs the f32 PyTorch model, validated to 5e-2.
    ref_f32 = reference_forward_f32(x, params)
    assert jnp.allclose(out, ref_f32, atol=5e-2, rtol=5e-2), \
        "mismatch vs f32 reference beyond bf16 tolerance"

    # Larger non-divisible batch: exercises multi-step grid + ragged final tile.
    x2 = jax.random.normal(kx2, (37, 1, 28, 28), dtype=jnp.float32)
    out2 = jax.block_until_ready(simple_nn_forward(x2, params))
    assert out2.shape == (37, N_OUT)
    assert jnp.allclose(out2, reference_forward_bf16(x2, params), atol=1e-3, rtol=1e-3), \
        "ragged-tile mismatch vs bf16-emulating reference"

    print("KERNEL_OK")
</pallas_src>

<mosaic_0001>
module attributes {stable_mosaic.version = 11 : i64} {
  func.func @mlp_kernel(%arg0: i32, %arg1: memref<2x784xf32, #tpu.memory_space<vmem>>, %arg2: memref<784x128xbf16, #tpu.memory_space<vmem>>, %arg3: memref<1x128xf32, #tpu.memory_space<vmem>>, %arg4: memref<128x128xbf16, #tpu.memory_space<vmem>>, %arg5: memref<1x128xf32, #tpu.memory_space<vmem>>, %arg6: memref<128x128xbf16, #tpu.memory_space<vmem>>, %arg7: memref<1x128xf32, #tpu.memory_space<vmem>>, %arg8: memref<2x128xf32, #tpu.memory_space<vmem>>) attributes {dimension_semantics = [#tpu.dimension_semantics<parallel>], iteration_bounds = array<i64: 1>, scalar_prefetch = 0 : i64, scratch_operands = 0 : i64, tpu.core_type = #tpu.core_type<tc>, window_params = [{transform_indices = @transform_0, window_bounds = array<i64: 2, 784>}, {pipeline_mode = #tpu.pipeline_mode<synchronous>, transform_indices = @transform_1, window_bounds = array<i64: 784, 128>}, {pipeline_mode = #tpu.pipeline_mode<synchronous>, transform_indices = @transform_2, window_bounds = array<i64: 1, 128>}, {pipeline_mode = #tpu.pipeline_mode<synchronous>, transform_indices = @transform_3, window_bounds = array<i64: 128, 128>}, {pipeline_mode = #tpu.pipeline_mode<synchronous>, transform_indices = @transform_4, window_bounds = array<i64: 1, 128>}, {pipeline_mode = #tpu.pipeline_mode<synchronous>, transform_indices = @transform_5, window_bounds = array<i64: 128, 128>}, {pipeline_mode = #tpu.pipeline_mode<synchronous>, transform_indices = @transform_6, window_bounds = array<i64: 1, 128>}, {transform_indices = @transform_7, window_bounds = array<i64: 2, 128>}]} {
    %c0 = arith.constant 0 : index
    %c0_0 = arith.constant 0 : index
    %0 = vector.load %arg1[%c0, %c0_0] : memref<2x784xf32, #tpu.memory_space<vmem>>, vector<2x784xf32>
    %1 = arith.truncf %0 : vector<2x784xf32> to vector<2x784xbf16>
    %c0_1 = arith.constant 0 : index
    %c0_2 = arith.constant 0 : index
    %2 = vector.load %arg2[%c0_1, %c0_2] : memref<784x128xbf16, #tpu.memory_space<vmem>>, vector<784x128xbf16>
    %cst = arith.constant dense<0.000000e+00> : vector<2x128xf32>
    %3 = tpu.matmul %1, %2, %cst {dimension_numbers = #tpu.dot_dimension_numbers<[1], [0], [0], [1], [0, 0, 1, 1], [], []>} : vector<2x784xbf16>, vector<784x128xbf16>, vector<2x128xf32> -> vector<2x128xf32>
    %c0_3 = arith.constant 0 : index
    %c0_4 = arith.constant 0 : index
    %4 = vector.load %arg3[%c0_3, %c0_4] : memref<1x128xf32, #tpu.memory_space<vmem>>, vector<1x128xf32>
    %5 = vector.broadcast %4 : vector<1x128xf32> to vector<2x128xf32>
    %6 = arith.addf %3, %5 : vector<2x128xf32>
    %cst_5 = arith.constant 0.000000e+00 : f32
    %7 = vector.broadcast %cst_5 : f32 to vector<2x128xf32>
    %8 = arith.maximumf %6, %7 : vector<2x128xf32>
    %9 = arith.truncf %8 : vector<2x128xf32> to vector<2x128xbf16>
    %c0_6 = arith.constant 0 : index
    %c0_7 = arith.constant 0 : index
    %10 = vector.load %arg4[%c0_6, %c0_7] : memref<128x128xbf16, #tpu.memory_space<vmem>>, vector<128x128xbf16>
    %cst_8 = arith.constant dense<0.000000e+00> : vector<2x128xf32>
    %11 = tpu.matmul %9, %10, %cst_8 {dimension_numbers = #tpu.dot_dimension_numbers<[1], [0], [0], [1], [0, 0, 1, 1], [], []>} : vector<2x128xbf16>, vector<128x128xbf16>, vector<2x128xf32> -> vector<2x128xf32>
    %c0_9 = arith.constant 0 : index
    %c0_10 = arith.constant 0 : index
    %12 = vector.load %arg5[%c0_9, %c0_10] : memref<1x128xf32, #tpu.memory_space<vmem>>, vector<1x128xf32>
    %13 = vector.broadcast %12 : vector<1x128xf32> to vector<2x128xf32>
    %14 = arith.addf %11, %13 : vector<2x128xf32>
    %cst_11 = arith.constant 0.000000e+00 : f32
    %15 = vector.broadcast %cst_11 : f32 to vector<2x128xf32>
    %16 = arith.maximumf %14, %15 : vector<2x128xf32>
    %17 = arith.truncf %16 : vector<2x128xf32> to vector<2x128xbf16>
    %c0_12 = arith.constant 0 : index
    %c0_13 = arith.constant 0 : index
    %18 = vector.load %arg6[%c0_12, %c0_13] : memref<128x128xbf16, #tpu.memory_space<vmem>>, vector<128x128xbf16>
    %cst_14 = arith.constant dense<0.000000e+00> : vector<2x128xf32>
    %19 = tpu.matmul %17, %18, %cst_14 {dimension_numbers = #tpu.dot_dimension_numbers<[1], [0], [0], [1], [0, 0, 1, 1], [], []>} : vector<2x128xbf16>, vector<128x128xbf16>, vector<2x128xf32> -> vector<2x128xf32>
    %c0_15 = arith.constant 0 : index
    %c0_16 = arith.constant 0 : index
    %20 = vector.load %arg7[%c0_15, %c0_16] : memref<1x128xf32, #tpu.memory_space<vmem>>, vector<1x128xf32>
    %21 = vector.broadcast %20 : vector<1x128xf32> to vector<2x128xf32>
    %22 = arith.addf %19, %21 : vector<2x128xf32>
    %c0_17 = arith.constant 0 : index
    %c0_18 = arith.constant 0 : index
    %23 = vector.load %arg8[%c0_17, %c0_18] : memref<2x128xf32, #tpu.memory_space<vmem>>, vector<2x128xf32>
    tpu.vector_store %arg8[%c0_17, %c0_18], %22 {strides = array<i32>} : memref<2x128xf32, #tpu.memory_space<vmem>>, vector<2x128xf32>,
    return
  }
  func.func @transform_0(%arg0: i32) -> (i32, i32) {
    %c0_i32 = arith.constant 0 : i32
    %c0_i32_0 = arith.constant 0 : i32
    return %arg0, %c0_i32 : i32, i32
  }
  func.func @transform_1(%arg0: i32) -> (i32, i32) {
    %c0_i32 = arith.constant 0 : i32
    %c0_i32_0 = arith.constant 0 : i32
    %c0_i32_1 = arith.constant 0 : i32
    return %c0_i32, %c0_i32_0 : i32, i32
  }
  func.func @transform_2(%arg0: i32) -> (i32, i32) {
    %c0_i32 = arith.constant 0 : i32
    %c0_i32_0 = arith.constant 0 : i32
    %c0_i32_1 = arith.constant 0 : i32
    return %c0_i32, %c0_i32_0 : i32, i32
  }
  func.func @transform_3(%arg0: i32) -> (i32, i32) {
    %c0_i32 = arith.constant 0 : i32
    %c0_i32_0 = arith.constant 0 : i32
    %c0_i32_1 = arith.constant 0 : i32
    return %c0_i32, %c0_i32_0 : i32, i32
  }
  func.func @transform_4(%arg0: i32) -> (i32, i32) {
    %c0_i32 = arith.constant 0 : i32
    %c0_i32_0 = arith.constant 0 : i32
    %c0_i32_1 = arith.constant 0 : i32
    return %c0_i32, %c0_i32_0 : i32, i32
  }
  func.func @transform_5(%arg0: i32) -> (i32, i32) {
    %c0_i32 = arith.constant 0 : i32
    %c0_i32_0 = arith.constant 0 : i32
    %c0_i32_1 = arith.constant 0 : i32
    return %c0_i32, %c0_i32_0 : i32, i32
  }
  func.func @transform_6(%arg0: i32) -> (i32, i32) {
    %c0_i32 = arith.constant 0 : i32
    %c0_i32_0 = arith.constant 0 : i32
    %c0_i32_1 = arith.constant 0 : i32
    return %c0_i32, %c0_i32_0 : i32, i32
  }
  func.func @transform_7(%arg0: i32) -> (i32, i32) {
    %c0_i32 = arith.constant 0 : i32
    %c0_i32_0 = arith.constant 0 : i32
    return %arg0, %c0_i32 : i32, i32
  }
}

</mosaic_0001>

<bundles_post_ra>
// kernel: tpu_custom_call.1
= control target key start
LH: loop header
LB: loop body
LE: loop exit
PB: predicated region body
PF: predicated region fallthrough
CT: control target
= control target key end

     0   :  { %12 = vsyncpa [#allocation3], 0  ;;  %s1487_s0 = inlined_call_operand.hbm [shape: f32[2,784], index: 0, kind: input, shape index: {}]   ;;  %s1488_s1 = inlined_call_operand.hbm [shape: bf16[784,128], index: 1, kind: input, shape index: {}]   ;;  %s1489_s2 = inlined_call_operand.vmem [shape: f32[1,128], index: 2, kind: input, shape index: {}]   ;;  %s1490_s3 = inlined_call_operand.hbm [shape: bf16[128,128], index: 3, kind: input, shape index: {}]   ;;  %s1491_s4 = inlined_call_operand.vmem [shape: f32[1,128], index: 4, kind: input, shape index: {}]   ;;  %s1492_s5 = inlined_call_operand.hbm [shape: bf16[128,128], index: 5, kind: input, shape index: {}]   ;;  %s1493_s6 = inlined_call_operand.vmem [shape: f32[1,128], index: 6, kind: input, shape index: {}]   ;;  %s1494_s7 = inlined_call_operand.hbm [shape: f32[2,128], index: 7, kind: output, shape index: {}]  }
   0x1   :  { %13 = vsyncpa [#allocation6], 0 }
   0x2   :  { %14 = vsyncpa [#allocation9], 0 }
   0x3   :  { %15 = vsyncpa [#allocation4], 0  ;;  %s1335_s24 = smov [#allocation5]   ;;  %s1217_s28 = scalar_lea.hbm %s1488_s1, 6272 }
   0x4   :  { %s31_s25 = sshll.u32 %s1335_s24, 4  ;;  %p1218_p0 = scmp.ne.s32.totalorder %s1488_s1, %s1217_s28  ;;  %s32_s25 = int_to_ptr.vmem [resolvable:$true] %s31_s25 }
   0x5   :  { %p1221_p1 = scmp.lt.u32.totalorder %s1217_s28, %s1488_s1 }
   0x7   :  { %p1223_p2 = pnand %p1221_p1, %p1218_p0 }
   0x9   :  { %1226 = shalt.err (!%p1223_p2)
}
   0xa   :  { %s1227_s10 = scalar_lea.vmem %s32_s25, 6272  ;;  %p1232_p4 = scmp.lt.s32.totalorder %s32_s25, %s32_s25 }
   0xb   :  { %p1228_p3 = scmp.ne.s32.totalorder %s32_s25, %s1227_s10  ;;  %p1233_p5 = scmp.lt.s32.totalorder %s1227_s10, %s1227_s10 }
   0xd   :  { %p1234_p6 = por %p1233_p5, %p1232_p4 }
   0xf   :  { %p1235_p7 = pnand %p1234_p6, %p1228_p3 }
  0x11   :  { %1238 = shalt.err (!%p1235_p7)
}
  0x12   :  { %s1336_s11 = smov 64   ;;  %s1337_s12 = smov 4  }
  0x13   :  { %37 = dma.hbm_to_vmem [thread:$0]  %s1488_s1, 6272, %s32_s25, [#allocation6], %s1336_s11, %s1336_s11, %s1337_s12  }
  0x14   :  { %s1338_s15 = smov [#allocation2]   ;;  %s1339_s17 = smov [#allocation7]  }
  0x15   :  { %s22_s16 = sshll.u32 %s1338_s15, 4  ;;  %s45_s18 = sshll.u32 %s1339_s17, 4  ;;  %s23_s16 = int_to_ptr.vmem [resolvable:$true] %s22_s16  ;;  %s46_s18 = int_to_ptr.vmem [resolvable:$true] %s45_s18 }
  0x16   :  { %s1239_s21 = scalar_lea.hbm %s1487_s0, 224 }
  0x17   :  { %p1240_p8 = scmp.ne.s32.totalorder %s1487_s0, %s1239_s21  ;;  %p1243_p9 = scmp.lt.u32.totalorder %s1239_s21, %s1487_s0 }
  0x19   :  { %p1245_p10 = pnand %p1243_p9, %p1240_p8 }
  0x1b   :  { %1248 = shalt.err (!%p1245_p10)
}
  0x1c   :  { %s1249_s1 = scalar_lea.vmem %s23_s16, 224  ;;  %p1254_p12 = scmp.lt.s32.totalorder %s23_s16, %s23_s16 }
  0x1d   :  { %p1250_p11 = scmp.ne.s32.totalorder %s23_s16, %s1249_s1  ;;  %p1255_p13 = scmp.lt.s32.totalorder %s1249_s1, %s1249_s1 }
  0x1f   :  { %p1256_p0 = por %p1255_p13, %p1254_p12 }
  0x21   :  { %p1257_p1 = pnand %p1256_p0, %p1250_p11 }
  0x23   :  { %1260 = shalt.err (!%p1257_p1)
}
  0x24   :  { %25 = dma.hbm_to_vmem [thread:$0]  %s1487_s0, 224, %s23_s16, [#allocation3]  }
  0x25   :  { %s1261_s30 = scalar_lea.hbm %s1490_s3, 1024 }
  0x26   :  { %p1262_p2 = scmp.ne.s32.totalorder %s1490_s3, %s1261_s30  ;;  %p1265_p3 = scmp.lt.u32.totalorder %s1261_s30, %s1490_s3 }
  0x28   :  { %p1267_p4 = pnand %p1265_p3, %p1262_p2 }
  0x2a   :  { %1270 = shalt.err (!%p1267_p4)
}
  0x2b   :  { %s1271_s14 = scalar_lea.vmem %s46_s18, 1024  ;;  %p1276_p6 = scmp.lt.s32.totalorder %s46_s18, %s46_s18 }
  0x2c   :  { %p1272_p5 = scmp.ne.s32.totalorder %s46_s18, %s1271_s14  ;;  %p1277_p7 = scmp.lt.s32.totalorder %s1271_s14, %s1271_s14 }
  0x2e   :  { %p1278_p8 = por %p1277_p7, %p1276_p6 }
  0x30   :  { %p1279_p9 = pnand %p1278_p8, %p1272_p5 }
  0x32   :  { %1282 = shalt.err (!%p1279_p9)
}
  0x33   :  { %51 = dma.hbm_to_vmem [thread:$0]  %s1490_s3, 1024, %s46_s18, [#allocation6], %s1336_s11, %s1336_s11, %s1337_s12  }
  0x34   :  { %s1340_s16 = smov [#allocation8]   ;;  %s1283_s21 = scalar_lea.hbm %s1492_s5, 1024 }
  0x35   :  { %s59_s17 = sshll.u32 %s1340_s16, 4  ;;  %p1284_p10 = scmp.ne.s32.totalorder %s1492_s5, %s1283_s21  ;;  %s60_s17 = int_to_ptr.vmem [resolvable:$true] %s59_s17 }
  0x36   :  { %p1287_p11 = scmp.lt.u32.totalorder %s1283_s21, %s1492_s5 }
  0x38   :  { %p1289_p12 = pnand %p1287_p11, %p1284_p10 }
  0x3a   :  { %1292 = shalt.err (!%p1289_p12)
}
  0x3b   :  { %s1293_s1 = scalar_lea.vmem %s60_s17, 1024  ;;  %p1298_p0 = scmp.lt.s32.totalorder %s60_s17, %s60_s17 }
  0x3c   :  { %p1294_p13 = scmp.ne.s32.totalorder %s60_s17, %s1293_s1  ;;  %p1299_p1 = scmp.lt.s32.totalorder %s1293_s1, %s1293_s1 }
  0x3e   :  { %p1300_p2 = por %p1299_p1, %p1298_p0 }
  0x40   :  { %p1301_p3 = pnand %p1300_p2, %p1294_p13 }
  0x42   :  { %1304 = shalt.err (!%p1301_p3)
}
  0x43   :  { %65 = dma.hbm_to_vmem [thread:$0]  %s1492_s5, 1024, %s60_s17, [#allocation9], %s1336_s11, %s1336_s11, %s1337_s12  }
  0x44   :  { %1327 = dma.done.wait [#allocation3], 224  }
  0x45   :  { %1328 = vsyncadd [#allocation3], 4294967072 }
  0x46   :  { %1329 = dma.done.wait [#allocation6], 7296  }
  0x47   :  { %1330 = vsyncadd [#allocation6], 4294960000 }
  0x48   :  { %1331 = dma.done.wait [#allocation9], 1024  }
  0x49   :  { %1332 = vsyncadd [#allocation9], 4294966272  ;;  %v1150_v0 = vld [vmem:[#allocation5 + $0x40] sm:$0xff]   ;;  %v1154_v4 = vld [vmem:[#allocation5 + $0x48] sm:$0xff]   ;;  %v1341_v21 = vmov 1983009808   ;;  %v89_v23 = vlaneseq }
  0x4a   :  { %v1151_v1 = vld [vmem:[#allocation5] sm:$0xff]   ;;  %1008 = vmatprep.subr.bf16.mxu0 %v1150_v0  ;;  %v1155_v5 = vld [vmem:[#allocation5 + $0x8] sm:$0xff]   ;;  %v1158_v8 = vld [vmem:[#allocation5 + $0x50] sm:$0xff]   ;;  %v87_v22 = vunpack.c.l.s4 %v1341_v21  ;;  %v1342_v45 = vmov 0.0   ;;  %vm1343_vm0 = vmmov 0   ;;  %vm531_vm1 = vcmask 130048  }
  0x4b   :  { %v1152_v2 = vld [vmem:[#allocation5 + $0xc0] sm:$0xff]   ;;  %1009 = vmatpush3.bf16.msra.mxu0 %v1151_v1  ;;  %v1156_v6 = vld [vmem:[#allocation5 + $0xc8] sm:$0xff]   ;;  %v1159_v9 = vld [vmem:[#allocation5 + $0x10] sm:$0xff]   ;;  %v90_v29 = vshrl.u32 %v89_v23, 7  ;;  %s1344_s28 = smov [#allocation10]  }
  0x4c   :  { %v1153_v3 = vld [vmem:[#allocation5 + $0x80] sm:$0xff]   ;;  %1030 = vmatprep.subr.bf16.mxu1 %v1152_v2  ;;  %1010 = vmatprep.subr.bf16.mxu0 %v1154_v4  ;;  %v1157_v7 = vld [vmem:[#allocation5 + $0x88] sm:$0xff]   ;;  %v1160_v10 = vld [vmem:[#allocation5 + $0xd0] sm:$0xff]   ;;  %v88_v28 = vunpack.c.0.s8 %v87_v22  ;;  %s928_s29 = sshll.u32 %s1344_s28, 4  ;;  %s929_s29 = int_to_ptr.vmem [resolvable:$true] %s928_s29 }
  0x4d   :  { %1031 = vmatpush3.bf16.msra.mxu1 %v1153_v3  ;;  %v1161_v11 = vld [vmem:[#allocation5 + $0x90] sm:$0xff]   ;;  %v1162_v12 = vld [vmem:[#allocation5 + $0x58] sm:$0xff]   ;;  %v1166_v16 = vld [vmem:[#allocation5 + $0x60] sm:$0xff]   ;;  %p1310_p5 = scmp.lt.s32.totalorder %s929_s29, %s929_s29 }
  0x4e   :  { %1032 = vmatprep.subr.bf16.mxu1 %v1156_v6  ;;  %v1163_v13 = vld [vmem:[#allocation5 + $0x18] sm:$0xff]   ;;  %v1167_v17 = vld [vmem:[#allocation5 + $0x20] sm:$0xff]   ;;  %v1170_v20 = vld [vmem:[#allocation5 + $0x68] sm:$0xff]   ;;  %v91_v34 = vsub.s32 %v88_v28, %v90_v29 }
  0x4f   :  { %1011 = vmatpush3.bf16.msra.mxu0 %v1155_v5  ;;  %v1164_v14 = vld [vmem:[#allocation5 + $0xd8] sm:$0xff]   ;;  %v1168_v18 = vld [vmem:[#allocation5 + $0xe0] sm:$0xff]   ;;  %v1171_v24 = vld [vmem:[#allocation5 + $0x28] sm:$0xff]  }
  0x50   :  { %1012 = vmatprep.subr.bf16.mxu0 %v1158_v8  ;;  %v1165_v15 = vld [vmem:[#allocation5 + $0x98] sm:$0xff]   ;;  %v1169_v19 = vld [vmem:[#allocation5 + $0xa0] sm:$0xff]   ;;  %v1172_v25 = vld [vmem:[#allocation5 + $0xe8] sm:$0xff]  }
  0x51   :  { %1033 = vmatpush3.bf16.msra.mxu1 %v1157_v7  ;;  %v1173_v26 = vld [vmem:[#allocation5 + $0xa8] sm:$0xff]   ;;  %v1174_v27 = vld [vmem:[#allocation5 + $0x70] sm:$0xff]   ;;  %v1178_v33 = vld [vmem:[#allocation5 + $0x78] sm:$0xff]  }
  0x52   :  { %1034 = vmatprep.subr.bf16.mxu1 %v1160_v10  ;;  %v1175_v30 = vld [vmem:[#allocation5 + $0x30] sm:$0xff]   ;;  %v1179_v35 = vld [vmem:[#allocation5 + $0x38] sm:$0xff]   ;;  %v1182_v41 = vld [vmem:[#allocation5 + $0x140] sm:$0xff]  }
  0x53   :  { %1013 = vmatpush3.bf16.msra.mxu0 %v1159_v9  ;;  %v1176_v31 = vld [vmem:[#allocation5 + $0xf0] sm:$0xff]   ;;  %v1180_v36 = vld [vmem:[#allocation5 + $0xf8] sm:$0xff]   ;;  %v1184_v48 = vld [vmem:[#allocation5 + $0x100] sm:$0xff]  }
  0x54   :  { %1014 = vmatprep.subr.bf16.mxu0 %v1162_v12  ;;  %v1177_v32 = vld [vmem:[#allocation5 + $0xb0] sm:$0xff]   ;;  %v1181_v39 = vld [vmem:[#allocation5 + $0xb8] sm:$0xff]   ;;  %v1185_v50 = vld [vmem:[#allocation5 + $0x148] sm:$0xff]  }
  0x55   :  { %1035 = vmatpush3.bf16.msra.mxu1 %v1161_v11  ;;  %v81_v37 = vld [vmem:[#allocation2] sm:$0xff]  ;;  %v1186_v52 = vld [vmem:[#allocation5 + $0x108] sm:$0xff]   ;;  %v1191_v57 = vld [vmem:[#allocation5 + $0x160] sm:$0xff]  }
  0x56   :  { %1036 = vmatprep.subr.bf16.mxu1 %v1164_v14  ;;  %v92_v38 = vrot.slane %v81_v37, %v91_v34  ;;  %v85_v40 = vcombine.high %v81_v37, %v81_v37  ;;  %v1187_v53 = vld [vmem:[#allocation5 + $0x150] sm:$0xff]   ;;  %v1189_v55 = vld [vmem:[#allocation5 + $0x158] sm:$0xff]   ;;  %v1199_v58 = vld [vmem:[#allocation5 + $0x180] sm:$0xff]  }
  0x57   :  { %1015 = vmatpush3.bf16.msra.mxu0 %v1163_v13  ;;  %v1188_v54 = vld [vmem:[#allocation5 + $0x110] sm:$0xff]   ;;  %v1190_v56 = vld [vmem:[#allocation5 + $0x118] sm:$0xff]   ;;  %v1192_v60 = vld [vmem:[#allocation5 + $0x120] sm:$0xff]  }
  0x58   :  { %1016 = vmatprep.subr.bf16.mxu0 %v1166_v16  ;;  %v100_v42 = vcombine.high %v92_v38, %v92_v38  ;;  %v99_v43 = vrot.slane %v85_v40, %v91_v34  ;;  %v125_v44 = vpack.c.bf16 %v92_v38, %v92_v38  ;;  %v82_v59 = vld [vmem:[#allocation2 + $0x8] sm:$0x3f]  ;;  %v1193_v63 = vld [vmem:[#allocation5 + $0x168] sm:$0xff]   ;;  %v1195_v5 = vld [vmem:[#allocation5 + $0x170] sm:$0xff]  }
  0x59   :  { %1037 = vmatpush3.bf16.msra.mxu1 %v1165_v15  ;;  %v102_v61 = vcombine.high %v82_v59, %v82_v59  ;;  %v109_v62 = vrot.slane %v82_v59, %v91_v34  ;;  %v1194_v2 = vld [vmem:[#allocation5 + $0x128] sm:$0xff]   ;;  %v1196_v6 = vld [vmem:[#allocation5 + $0x130] sm:$0xff]   ;;  %v1197_v7 = vld [vmem:[#allocation5 + $0x178] sm:$0xff]  }
  0x5a   :  { %1038 = vmatprep.subr.bf16.mxu1 %v1168_v18  ;;  %v126_v46 = vpack.c.bf16 %v100_v42, %v100_v42  ;;  %v101_v47 = vcombine.high %v99_v43, %v99_v43  ;;  %v127_v49 = vpack.c.bf16 %v99_v43, %v99_v43  ;;  %v1198_v8 = vld [vmem:[#allocation5 + $0x138] sm:$0xff]   ;;  %v1201_v10 = vld [vmem:[#allocation7] sm:$0xff]   ;;  %v1202_v11 = vld [vmem:[#allocation7 + $0x8] sm:$0xff]  }
  0x5b   :  { %1017 = vmatpush3.bf16.msra.mxu0 %v1167_v17  ;;  %v116_v0 = vrot.slane %v102_v61, %v91_v34  ;;  %v117_v1 = vcombine.high %v109_v62, %v109_v62  ;;  %v129_v9 = vpack.c.bf16 %v109_v62, %v109_v62  ;;  %v1203_v12 = vld [vmem:[#allocation7 + $0x10] sm:$0xff]   ;;  %v1204_v13 = vld [vmem:[#allocation7 + $0x18] sm:$0xff]   ;;  %v1205_v14 = vld [vmem:[#allocation7 + $0x20] sm:$0xff]  }
  0x5c   :  { %1018 = vmatprep.subr.bf16.mxu0 %v1170_v20  ;;  %567 = vmatprep.mubr.bf16.mxu0 %v126_v46  ;;  %v128_v51 = vpack.c.bf16 %v101_v47, %v101_v47  ;;  %v1206_v15 = vld [vmem:[#allocation7 + $0x28] sm:$0xff]   ;;  %v1207_v16 = vld [vmem:[#allocation7 + $0x30] sm:$0xff]   ;;  %v1208_v17 = vld [vmem:[#allocation7 + $0x38] sm:$0xff]  }
  0x5d   :  { %1039 = vmatpush3.bf16.msra.mxu1 %v1169_v19  ;;  %v130_v3 = vpack.c.bf16 %v117_v1, %v117_v1  ;;  %v131_v4 = vpack.c.bf16 %v116_v0, %v116_v0  ;;  %v1209_v18 = vld [vmem:[#allocation8] sm:$0xff]   ;;  %v1210_v19 = vld [vmem:[#allocation8 + $0x8] sm:$0xff]   ;;  %v1211_v20 = vld [vmem:[#allocation8 + $0x10] sm:$0xff]  }
  0x5e   :  { %1040 = vmatprep.subr.bf16.mxu1 %v1172_v25  ;;  %607 = vmatprep.mubr.bf16.mxu1 %v128_v51  ;;  %v1212_v21 = vld [vmem:[#allocation8 + $0x18] sm:$0xff]   ;;  %v1213_v22 = vld [vmem:[#allocation8 + $0x20] sm:$0xff]   ;;  %v1214_v23 = vld [vmem:[#allocation8 + $0x28] sm:$0xff]  }
  0x5f   :  { %1019 = vmatpush3.bf16.msra.mxu0 %v1171_v24  ;;  %v939_v25 = vld [vmem:[%s1489_s2] ss:$0 sm:$0xff]  ;;  %v1215_v51 = vld [vmem:[#allocation8 + $0x30] sm:$0xff]  }
  0x60   :  { %1020 = vmatprep.subr.bf16.mxu0 %v1174_v27  ;;  %v999_v61 = vld [vmem:[%s1493_s6] ss:$0 sm:$0xff] }
  0x61   :  { %1041 = vmatpush3.bf16.msra.mxu1 %v1173_v26 }
  0x62   :  { %1042 = vmatprep.subr.bf16.mxu1 %v1176_v31 }
  0x63   :  { %1021 = vmatpush3.bf16.msra.mxu0 %v1175_v30 }
  0x64   :  { %1022 = vmatprep.subr.bf16.mxu0 %v1178_v33 }
  0x65   :  { %1043 = vmatpush3.bf16.msra.mxu1 %v1177_v32 }
  0x66   :  { %1044 = vmatprep.subr.bf16.mxu1 %v1180_v36 }
  0x67   :  { %1023 = vmatpush3.bf16.msra.mxu0 %v1179_v35 }
  0x68   :  { %1052 = vmatprep.subr.bf16.mxu0 %v1182_v41 }
  0x69   :  { %1045 = vmatpush3.bf16.msra.mxu1 %v1181_v39 }
  0x6a   :  { %1094 = vmatprep.subr.bf16.mxu1 %v1342_v45  ;;  %568 = vmatmul.mubr.bf16.vlgmr.msra.gmra.mrb[0].mxu0 %v125_v44 }
  0x6b   :  { %1053 = vmatpush3.bf16.msra.mxu0 %v1184_v48  ;;  %647 = vmatprep.mubr.bf16.mxu0 %v130_v3 }
  0x6c   :  { %608 = vmatmul.mubr.bf16.vlgmr.msra.gmra.mrb[0].mxu1 %v127_v49  ;;  %1054 = vmatprep.subr.bf16.mxu0 %v1185_v50 }
  0x6d   :  { %1096 = vmatprep.mubr.msk.bf16.mxu1 %vm1343_vm0, %v1342_v45  ;;  %1095 = vmatpush3.bf16.msra.mxu1 %v1199_v58 }
  0x6e   :  { %1100 = vmatprep.subr.bf16.mxu1 %v1342_v45 }
  0x6f   :  { %1055 = vmatpush3.bf16.msra.mxu0 %v1186_v52  ;;  %v1216_v52 = vld [vmem:[#allocation8 + $0x38] sm:$0xff]  }
  0x70   :  { %1056 = vmatprep.subr.bf16.mxu0 %v1187_v53  ;;  %v990_v53 = vld [vmem:[%s1491_s4] ss:$0 sm:$0xff]  ;;  %s1305_s4 = scalar_lea.vmem %s929_s29, 32 }
  0x71   :  { %p1306_p4 = scmp.ne.s32.totalorder %s929_s29, %s1305_s4  ;;  %p1311_p6 = scmp.lt.s32.totalorder %s1305_s4, %s1305_s4 }
  0x73   :  { %1057 = vmatpush3.bf16.msra.mxu0 %v1188_v54  ;;  %p1312_p7 = por %p1311_p6, %p1310_p5 }
  0x74   :  { %1058 = vmatprep.subr.bf16.mxu0 %v1189_v55  ;;  %1097 = vmatmul.mubr.msk.bf16.vlgmr.msra.gmra.mrb[4].mxu1 %vm531_vm1, %v131_v4 }
  0x75   :  { %1116 = vmatprep.mubr.msk.bf16.mxu1 %vm1343_vm0, %v1342_v45  ;;  %1101 = vmatpush3.bf16.msra.mxu1 %v1201_v10  ;;  %p1313_p8 = pnand %p1312_p7, %p1306_p4 }
  0x76   :  { %1102 = vmatprep.subr.bf16.mxu1 %v1342_v45 }
  0x77   :  { %1059 = vmatpush3.bf16.msra.mxu0 %v1190_v56 }
  0x78   :  { %1060 = vmatprep.subr.bf16.mxu0 %v1191_v57 }
  0x79   :  { %1103 = vmatpush3.bf16.msra.mxu1 %v1202_v11 }
  0x7a   :  { %1104 = vmatprep.subr.bf16.mxu1 %v1342_v45 }
  0x7b   :  { %1061 = vmatpush3.bf16.msra.mxu0 %v1192_v60 }
  0x7c   :  { %1062 = vmatprep.subr.bf16.mxu0 %v1193_v63 }
  0x7d   :  { %1105 = vmatpush3.bf16.msra.mxu1 %v1203_v12 }
  0x7e   :  { %1106 = vmatprep.subr.bf16.mxu1 %v1342_v45 }
  0x7f   :  { %1063 = vmatpush3.bf16.msra.mxu0 %v1194_v2 }
  0x80   :  { %1064 = vmatprep.subr.bf16.mxu0 %v1195_v5 }
  0x81   :  { %1107 = vmatpush3.bf16.msra.mxu1 %v1204_v13 }
  0x82   :  { %1108 = vmatprep.subr.bf16.mxu1 %v1342_v45 }
  0x83   :  { %1065 = vmatpush3.bf16.msra.mxu0 %v1196_v6 }
  0x84   :  { %1066 = vmatprep.subr.bf16.mxu0 %v1197_v7 }
  0x85   :  { %1109 = vmatpush3.bf16.msra.mxu1 %v1205_v14 }
  0x86   :  { %1110 = vmatprep.subr.bf16.mxu1 %v1342_v45 }
  0x87   :  { %1067 = vmatpush3.bf16.msra.mxu0 %v1198_v8 }
  0x88   :  { %1120 = vmatprep.subr.bf16.mxu0 %v1342_v45 }
  0x89   :  { %1111 = vmatpush3.bf16.msra.mxu1 %v1206_v15 }
  0x8a   :  { %648 = vmatmul.mubr.bf16.vlgmr.msra.gmra.mrb[4].mxu0 %v129_v9  ;;  %1112 = vmatprep.subr.bf16.mxu1 %v1342_v45 }
  0x8b   :  { %1136 = vmatprep.mubr.msk.bf16.mxu0 %vm1343_vm0, %v1342_v45  ;;  %1121 = vmatpush3.bf16.msra.mxu0 %v1209_v18 }
  0x8c   :  { %1122 = vmatprep.subr.bf16.mxu0 %v1342_v45 }
  0x8d   :  { %1113 = vmatpush3.bf16.msra.mxu1 %v1207_v16 }
  0x8e   :  { %1114 = vmatprep.subr.bf16.mxu1 %v1342_v45 }
  0x8f   :  { %1123 = vmatpush3.bf16.msra.mxu0 %v1210_v19 }
  0x90   :  { %1124 = vmatprep.subr.bf16.mxu0 %v1342_v45 }
  0x91   :  { %1115 = vmatpush3.bf16.msra.mxu1 %v1208_v17 }
  0x93   :  { %1125 = vmatpush3.bf16.msra.mxu0 %v1211_v20 }
  0x94   :  { %1126 = vmatprep.subr.bf16.mxu0 %v1342_v45 }
  0x97   :  { %1127 = vmatpush3.bf16.msra.mxu0 %v1212_v21 }
  0x98   :  { %1128 = vmatprep.subr.bf16.mxu0 %v1342_v45 }
  0x9b   :  { %1129 = vmatpush3.bf16.msra.mxu0 %v1213_v22 }
  0x9c   :  { %1130 = vmatprep.subr.bf16.mxu0 %v1342_v45 }
  0x9f   :  { %1131 = vmatpush3.bf16.msra.mxu0 %v1214_v23 }
  0xa0   :  { %1132 = vmatprep.subr.bf16.mxu0 %v1342_v45 }
  0xa3   :  { %1133 = vmatpush3.bf16.msra.mxu0 %v1215_v51 }
  0xa4   :  { %1134 = vmatprep.subr.bf16.mxu0 %v1342_v45 }
  0xa7   :  { %1135 = vmatpush3.bf16.msra.mxu0 %v1216_v52 }
 0x13d   :  { %v1024_v24 = vpop.f32.mrb[0].mxu0 }
 0x13e   :  { %v1025_v26 = vpop.f32.mrb[1].mxu0 }
 0x13f   :  { %v1026_v27 = vadd.f32 %v1025_v26, %v1024_v24  ;;  %v1027_v28 = vpop.f32.mrb[2].mxu0  ;;  %v1046_v29 = vpop.f32.mrb[0].mxu1 }
 0x140   :  { %v1028_v30 = vpop.f32.mrb[3].mxu0  ;;  %v1047_v31 = vpop.f32.mrb[1].mxu1 }
 0x141   :  { %v570_v32 = vadd.f32 %v1026_v27, %v939_v25  ;;  %v1048_v33 = vadd.f32 %v1047_v31, %v1046_v29  ;;  %v1049_v34 = vpop.f32.mrb[2].mxu1 }
 0x142   :  { %v1050_v35 = vpop.f32.mrb[3].mxu1 }
 0x143   :  { %v610_v36 = vadd.f32 %v1048_v33, %v570_v32 }
 0x147   :  { %v689_v37 = vpop.f32.mrb[4].mxu1 }
 0x148   :  { %v1098_v38 = vpop.f32.mrb[5].mxu1 }
 0x149   :  { %v692_v39 = vpop.f32.mrb[6].mxu1 }
 0x14a   :  { %v1099_v40 = vpop.f32.mrb[7].mxu1 }
 0x15d   :  { %v1068_v41 = vpop.f32.mrb[4].mxu0 }
 0x15e   :  { %v1069_v42 = vpop.f32.mrb[5].mxu0 }
 0x15f   :  { %v1070_v43 = vadd.f32 %v1069_v42, %v1068_v41  ;;  %v1071_v44 = vpop.f32.mrb[6].mxu0 }
 0x160   :  { %v1072_v46 = vpop.f32.mrb[7].mxu0 }
 0x161   :  { %v650_v47 = vadd.f32 %v1070_v43, %v610_v36 }
 0x163   :  { %v690_v48 = vadd.f32 %v689_v37, %v650_v47 }
 0x165   :  { %v695_v49 = vmax.f32 %v690_v48, 0.0 }
 0x167   :  { %v696_v50 = vpack.c.bf16 %v695_v49, %v695_v49 }
 0x169   :  { %1117 = vmatmul.mubr.bf16.vlgmr.msra.gmra.mrb[8].mxu1 %v696_v50 }
 0x23c   :  { %v802_v54 = vpop.f32.mrb[8].mxu1 }
 0x23d   :  { %v803_v55 = vadd.f32 %v990_v53, %v802_v54  ;;  %v1118_v56 = vpop.f32.mrb[9].mxu1 }
 0x23e   :  { %v805_v57 = vpop.f32.mrb[10].mxu1 }
 0x23f   :  { %v808_v58 = vmax.f32 %v803_v55, 0.0  ;;  %v1119_v59 = vpop.f32.mrb[11].mxu1 }
 0x241   :  { %v809_v60 = vpack.c.bf16 %v808_v58, %v808_v58 }
 0x243   :  { %1137 = vmatmul.mubr.bf16.vlgmr.msra.gmra.mrb[8].mxu0 %v809_v60 }
 0x316   :  { %v915_v45 = vpop.f32.mrb[8].mxu0 }
 0x317   :  { %v916_v62 = vadd.f32 %v999_v61, %v915_v45  ;;  %v1138_v63 = vpop.f32.mrb[9].mxu0 }
 0x318   :  { %v918_v0 = vpop.f32.mrb[10].mxu0 }
 0x319   :  { %921 = vst [vmem:[#allocation10] sm:$0x3] %v916_v62  ;;  %v1139_v1 = vpop.f32.mrb[11].mxu0 }
 0x31a   :  { %1316 = shalt.err (!%p1313_p8)
}
 0x31b   :  { %s1317_s6 = scalar_lea.hbm %s1494_s7, 32 }
 0x31c   :  { %p1318_p9 = scmp.ne.s32.totalorder %s1494_s7, %s1317_s6  ;;  %p1321_p10 = scmp.lt.u32.totalorder %s1317_s6, %s1494_s7 }
 0x31e   :  { %p1323_p11 = pnand %p1321_p10, %p1318_p9 }
 0x320   :  { %1326 = shalt.err (!%p1323_p11)
}
 0x321   :  { %931 = dma.vmem_to_hbm [thread:$0]  %s929_s29, 32, %s1494_s7, [#allocation4]  }
 0x322   :  { %1333 = dma.done.wait [#allocation4], 32  }
 0x323   :  { %1334 = vsyncadd [#allocation4], 4294967264 }
 0x324   :  { %935 = vsyncpa [#allocation3], 1 }
 0x325   :  { %936 = vsyncpa [#allocation6], 1 }
 0x326   :  { %937 = vsyncpa [#allocation9], 1 }
 0x327   :  { %938 = vsyncpa [#allocation4], 1 }

</bundles_post_ra>
